<compile_context>
chip_gen: v7x
topology: tpu7x:2x2x1
jax: 0.10.0
libtpu: 0.0.40
codegen_flags: <defaults>
</compile_context>

<pallas_src>
import functools

import jax
import jax.numpy as jnp
from jax.experimental import pallas as pl
from jax.experimental.pallas import tpu as pltpu


def _round_up(n, m):
    return ((n + m - 1) // m) * m


def _epilogue_dtype():
    """bf16 epilogue on v6e/v7x (bf16 VPU/EUP); f32 on v5e / unknown."""
    try:
        kind = jax.devices()[0].device_kind.lower()
    except Exception:
        return jnp.float32
    if any(tag in kind for tag in ("v6", "v7", "7x")):
        return jnp.bfloat16
    return jnp.float32


def _resident_spec(shape):
    """BlockSpec for a grid-invariant operand: constant index_map and (when
    available) a single VMEM buffer instead of the default double buffer."""
    index_map = lambda i: (0,) * len(shape)
    if hasattr(pl, "Buffered"):
        return pl.BlockSpec(shape, index_map, pipeline_mode=pl.Buffered(1))
    return pl.BlockSpec(shape, index_map)


def _adapter_kernel(x_ref, wd_ref, bd_ref, wu_ref, bu_ref, out_ref, *,
                    epilogue_dtype):
    # Cast the streamed x tile to the MXU dtype in-register (no wrapper pass).
    x = x_ref[...].astype(wd_ref.dtype)
    # Down-projection on the MXU (bf16 operands, f32 accumulation).
    h = jnp.dot(x, wd_ref[...], preferred_element_type=jnp.float32)
    # Bias + tanh epilogue (bf16 on v6e/v7x, f32 on v5e).
    h = jnp.tanh((h + bd_ref[...]).astype(epilogue_dtype))
    # Up-projection against the zero-padded (mid_dim, 3*dim) weight: columns
    # [0:dim] are exactly zero (the q block), [dim:3*dim] are kv.
    out = jnp.dot(h.astype(wu_ref.dtype), wu_ref[...],
                  preferred_element_type=jnp.float32)
    out_ref[...] = (out + bu_ref[...]).astype(out_ref.dtype)


def adapter_forward(x, w_down, b_down, w_up, b_up, *,
                    mxu_dtype=jnp.bfloat16, out_dtype=None,
                    max_block_rows=1024):
    """x: (B, S, dim) -> (B, S, 3*dim), matching the torch Adapter forward.

    w_down: (dim, mid_dim)   (== torch down.weight.T)
    w_up:   (mid_dim, 2*dim) (== torch up.weight.T)

    NOTE: matmul operands run through the MXU in `mxu_dtype` (bf16 by default,
    f32 accumulation).  Pass mxu_dtype=jnp.float32 if exact f32 parity with
    the torch module is required.  Weights may be pre-cast to bf16 outside
    jit so the per-call astype ops disappear.
    """
    B, S, dim = x.shape
    mid_dim = w_down.shape[1]
    assert w_down.shape == (dim, mid_dim)
    assert w_up.shape == (mid_dim, 2 * dim)

    N = B * S
    out_dtype = x.dtype if out_dtype is None else out_dtype
    epilogue_dtype = _epilogue_dtype()

    x2 = x.reshape(N, dim)  # free reshape; native dtype (cast happens in-kernel)

    # --- row tiling ---------------------------------------------------------
    if N <= max_block_rows:
        block_rows = _round_up(max(N, 8), 8)
    else:
        block_rows = max_block_rows
    # v7x has 2 TensorCores: for moderate N make sure the "parallel" row axis
    # has at least 2 grid steps so both cores get work.
    if N > 256 and pl.cdiv(N, block_rows) < 2:
        block_rows = _round_up(pl.cdiv(N, 2), 8)
    grid = (pl.cdiv(N, block_rows),)  # partial edge block handled by Pallas

    # --- operands -----------------------------------------------------------
    wd = w_down.astype(mxu_dtype)
    # Fuse the q-zero block into the up projection: pad `dim` zero columns in
    # front of W_up / b_up so the kernel writes the final 3*dim layout.
    wu = jnp.pad(w_up.astype(mxu_dtype), ((0, 0), (dim, 0)))
    bd = b_down.reshape(1, mid_dim).astype(jnp.float32)
    bu = jnp.pad(b_up.astype(jnp.float32), (dim, 0)).reshape(1, 3 * dim)

    # --- VMEM budget ---------------------------------------------------------
    xsz = jnp.dtype(x.dtype).itemsize
    msz = jnp.dtype(mxu_dtype).itemsize
    osz = jnp.dtype(out_dtype).itemsize
    esz = jnp.dtype(epilogue_dtype).itemsize
    bytes_est = (
        2 * block_rows * dim * xsz              # x tile (double-buffered)
        + 2 * block_rows * 3 * dim * osz        # out tile (double-buffered)
        + dim * mid_dim * msz                   # W_down (single buffer)
        + mid_dim * 3 * dim * msz               # W_up padded (single buffer)
        + (mid_dim + 3 * dim) * 4               # biases
        + block_rows * mid_dim * (4 + esz)      # h f32 accumulator + epilogue
        + block_rows * 3 * dim * 4              # kv f32 accumulator
    )
    try:
        vmem_cap = int(getattr(pltpu.get_tpu_info(), "vmem_capacity_bytes",
                               64 << 20))
    except Exception:
        vmem_cap = 64 << 20  # conservative (v7x per-TC capacity)
    vmem_limit = int(min(max(bytes_est * 2, 32 << 20), (vmem_cap * 3) // 4))

    kernel = functools.partial(_adapter_kernel, epilogue_dtype=epilogue_dtype)

    out2 = pl.pallas_call(
        kernel,
        out_shape=jax.ShapeDtypeStruct((N, 3 * dim), out_dtype),
        grid_spec=pltpu.PrefetchScalarGridSpec(
            num_scalar_prefetch=0,
            grid=grid,
            in_specs=[
                pl.BlockSpec((block_rows, dim), lambda i: (i, 0)),  # x rows
                _resident_spec((dim, mid_dim)),                     # W_down
                _resident_spec((1, mid_dim)),                       # b_down
                _resident_spec((mid_dim, 3 * dim)),                 # W_up (padded)
                _resident_spec((1, 3 * dim)),                       # b_up (padded)
            ],
            out_specs=pl.BlockSpec((block_rows, 3 * dim), lambda i: (i, 0)),
        ),
        compiler_params=pltpu.CompilerParams(
            dimension_semantics=("parallel",),
            vmem_limit_bytes=vmem_limit,
        ),
    )(x2, wd, bd, wu, bu)

    return out2.reshape(B, S, 3 * dim)


if __name__ == "__main__":
    # Small, deterministic setup consistent with the module.
    B, S = 2, 8
    dim, mid_dim = 32, 256

    key = jax.random.PRNGKey(0)
    kx, kwd, kbd, kwu, kbu = jax.random.split(key, 5)

    x = jax.random.normal(kx, (B, S, dim), dtype=jnp.float32)
    # Deterministic synthetic parameters, stored as (in, out) == torch W.T.
    w_down = jax.random.normal(kwd, (dim, mid_dim), dtype=jnp.float32) * 0.05
    b_down = jax.random.normal(kbd, (mid_dim,), dtype=jnp.float32) * 0.05
    w_up = jax.random.normal(kwu, (mid_dim, 2 * dim), dtype=jnp.float32) * 0.05
    b_up = jax.random.normal(kbu, (2 * dim,), dtype=jnp.float32) * 0.05

    # Pre-cast the matmul weights once outside the jitted forward (perf item).
    w_down_bf = w_down.astype(jnp.bfloat16)
    w_up_bf = w_up.astype(jnp.bfloat16)

    fwd = jax.jit(adapter_forward)
    out = jax.block_until_ready(fwd(x, w_down_bf, b_down, w_up_bf, b_up))
    assert out.shape == (B, S, 3 * dim)

    # q-block must be exactly zero (zero weight columns -> exact 0.0).
    assert jnp.all(out[..., :dim] == 0.0)

    # Reference matching the kernel's bf16-operand / f32-accumulate path.
    ep = _epilogue_dtype()
    xb = x.reshape(-1, dim).astype(jnp.bfloat16)
    h_ref = jnp.dot(xb, w_down_bf, preferred_element_type=jnp.float32) + b_down
    h_ref = jnp.tanh(h_ref.astype(ep))
    kv_ref = jnp.dot(h_ref.astype(jnp.bfloat16), w_up_bf,
                     preferred_element_type=jnp.float32) + b_up
    kv_ref = kv_ref.reshape(B, S, 2 * dim).astype(jnp.float32)
    ref = jnp.concatenate(
        [jnp.zeros((B, S, dim), jnp.float32), kv_ref], axis=-1)
    assert jnp.allclose(out, ref, atol=2e-2, rtol=2e-2)

    # Loose sanity check against the full-f32 (torch-equivalent) reference.
    h32 = jnp.tanh(x @ w_down + b_down)
    kv32 = h32 @ w_up + b_up
    ref32 = jnp.concatenate(
        [jnp.zeros((B, S, dim), jnp.float32), kv32], axis=-1)
    assert jnp.allclose(out, ref32, atol=5e-2, rtol=5e-2)

    print("KERNEL_OK")
</pallas_src>

<mosaic_0001>
module attributes {stable_mosaic.version = 11 : i64} {
  func.func @_adapter_kernel(%arg0: i32, %arg1: memref<16x32xf32, #tpu.memory_space<vmem>>, %arg2: memref<32x256xbf16, #tpu.memory_space<vmem>>, %arg3: memref<1x256xf32, #tpu.memory_space<vmem>>, %arg4: memref<256x96xbf16, #tpu.memory_space<vmem>>, %arg5: memref<1x96xf32, #tpu.memory_space<vmem>>, %arg6: memref<16x96xf32, #tpu.memory_space<vmem>>) attributes {dimension_semantics = [#tpu.dimension_semantics<parallel>], iteration_bounds = array<i64: 1>, scalar_prefetch = 0 : i64, scratch_operands = 0 : i64, tpu.core_type = #tpu.core_type<tc>, window_params = [{transform_indices = @transform_0, window_bounds = array<i64: 16, 32>}, {pipeline_mode = #tpu.pipeline_mode<synchronous>, transform_indices = @transform_1, window_bounds = array<i64: 32, 256>}, {pipeline_mode = #tpu.pipeline_mode<synchronous>, transform_indices = @transform_2, window_bounds = array<i64: 1, 256>}, {pipeline_mode = #tpu.pipeline_mode<synchronous>, transform_indices = @transform_3, window_bounds = array<i64: 256, 96>}, {pipeline_mode = #tpu.pipeline_mode<synchronous>, transform_indices = @transform_4, window_bounds = array<i64: 1, 96>}, {transform_indices = @transform_5, window_bounds = array<i64: 16, 96>}]} {
    %c0 = arith.constant 0 : index
    %c0_0 = arith.constant 0 : index
    %0 = vector.load %arg1[%c0, %c0_0] : memref<16x32xf32, #tpu.memory_space<vmem>>, vector<16x32xf32>
    %1 = arith.truncf %0 : vector<16x32xf32> to vector<16x32xbf16>
    %c0_1 = arith.constant 0 : index
    %c0_2 = arith.constant 0 : index
    %2 = vector.load %arg2[%c0_1, %c0_2] : memref<32x256xbf16, #tpu.memory_space<vmem>>, vector<32x256xbf16>
    %cst = arith.constant dense<0.000000e+00> : vector<16x256xf32>
    %3 = tpu.matmul %1, %2, %cst {dimension_numbers = #tpu.dot_dimension_numbers<[1], [0], [0], [1], [0, 0, 1, 1], [], []>} : vector<16x32xbf16>, vector<32x256xbf16>, vector<16x256xf32> -> vector<16x256xf32>
    %c0_3 = arith.constant 0 : index
    %c0_4 = arith.constant 0 : index
    %4 = vector.load %arg3[%c0_3, %c0_4] : memref<1x256xf32, #tpu.memory_space<vmem>>, vector<1x256xf32>
    %5 = vector.broadcast %4 : vector<1x256xf32> to vector<16x256xf32>
    %6 = arith.addf %3, %5 : vector<16x256xf32>
    %7 = math.tanh %6 : vector<16x256xf32>
    %8 = arith.truncf %7 : vector<16x256xf32> to vector<16x256xbf16>
    %c0_5 = arith.constant 0 : index
    %c0_6 = arith.constant 0 : index
    %9 = vector.load %arg4[%c0_5, %c0_6] : memref<256x96xbf16, #tpu.memory_space<vmem>>, vector<256x96xbf16>
    %cst_7 = arith.constant dense<0.000000e+00> : vector<16x96xf32>
    %10 = tpu.matmul %8, %9, %cst_7 {dimension_numbers = #tpu.dot_dimension_numbers<[1], [0], [0], [1], [0, 0, 1, 1], [], []>} : vector<16x256xbf16>, vector<256x96xbf16>, vector<16x96xf32> -> vector<16x96xf32>
    %c0_8 = arith.constant 0 : index
    %c0_9 = arith.constant 0 : index
    %11 = vector.load %arg5[%c0_8, %c0_9] : memref<1x96xf32, #tpu.memory_space<vmem>>, vector<1x96xf32>
    %12 = vector.broadcast %11 : vector<1x96xf32> to vector<16x96xf32>
    %13 = arith.addf %10, %12 : vector<16x96xf32>
    %c0_10 = arith.constant 0 : index
    %c0_11 = arith.constant 0 : index
    %14 = vector.load %arg6[%c0_10, %c0_11] : memref<16x96xf32, #tpu.memory_space<vmem>>, vector<16x96xf32>
    tpu.vector_store %arg6[%c0_10, %c0_11], %13 {strides = array<i32>} : memref<16x96xf32, #tpu.memory_space<vmem>>, vector<16x96xf32>,
    return
  }
  func.func @transform_0(%arg0: i32) -> (i32, i32) {
    %c0_i32 = arith.constant 0 : i32
    %c0_i32_0 = arith.constant 0 : i32
    return %arg0, %c0_i32 : i32, i32
  }
  func.func @transform_1(%arg0: i32) -> (i32, i32) {
    %c0_i32 = arith.constant 0 : i32
    %c0_i32_0 = arith.constant 0 : i32
    %c0_i32_1 = arith.constant 0 : i32
    return %c0_i32, %c0_i32_0 : i32, i32
  }
  func.func @transform_2(%arg0: i32) -> (i32, i32) {
    %c0_i32 = arith.constant 0 : i32
    %c0_i32_0 = arith.constant 0 : i32
    %c0_i32_1 = arith.constant 0 : i32
    return %c0_i32, %c0_i32_0 : i32, i32
  }
  func.func @transform_3(%arg0: i32) -> (i32, i32) {
    %c0_i32 = arith.constant 0 : i32
    %c0_i32_0 = arith.constant 0 : i32
    %c0_i32_1 = arith.constant 0 : i32
    return %c0_i32, %c0_i32_0 : i32, i32
  }
  func.func @transform_4(%arg0: i32) -> (i32, i32) {
    %c0_i32 = arith.constant 0 : i32
    %c0_i32_0 = arith.constant 0 : i32
    %c0_i32_1 = arith.constant 0 : i32
    return %c0_i32, %c0_i32_0 : i32, i32
  }
  func.func @transform_5(%arg0: i32) -> (i32, i32) {
    %c0_i32 = arith.constant 0 : i32
    %c0_i32_0 = arith.constant 0 : i32
    return %arg0, %c0_i32 : i32, i32
  }
}

</mosaic_0001>

<bundles_post_ra>
// kernel: adapter_forward.1
= control target key start
LH: loop header
LB: loop body
LE: loop exit
PB: predicated region body
PF: predicated region fallthrough
CT: control target
= control target key end

     0   :  { %v411_v2 = vmov 0   ;;  %vm61_vm0 = vcmask 261120   ;;  %s529_s0 = inlined_call_operand.vmem [shape: f32[16,32], index: 0, kind: input, shape index: {}]   ;;  %s530_s1 = inlined_call_operand.vmem [shape: bf16[32,256], index: 1, kind: input, shape index: {}]   ;;  %s531_s2 = inlined_call_operand.vmem [shape: f32[1,256], index: 2, kind: input, shape index: {}]   ;;  %s532_s3 = inlined_call_operand.vmem [shape: bf16[256,96], index: 3, kind: input, shape index: {}]   ;;  %s533_s4 = inlined_call_operand.vmem [shape: f32[1,96], index: 4, kind: input, shape index: {}]   ;;  %s534_s5 = inlined_call_operand.hbm [shape: f32[16,96], index: 5, kind: output, shape index: {}]  }
   0x1   :  { %v357_v0 = vld [vmem:[%s530_s1 + $0x4] ss:$8 sps:$4 sm:$0xff]   ;;  %v359_v1 = vld [vmem:[%s530_s1] ss:$8 sps:$4 sm:$0xff]   ;;  %97 = vmatprep.mubr.bf16.mxu0 %v411_v2  ;;  %v360_v3 = vld [vmem:[%s530_s1 + $0x14] ss:$8 sps:$4 sm:$0xff]  }
   0x2   :  { %65 = vmatprep.subr.bf16.mxu0 %v357_v0  ;;  %v362_v4 = vld [vmem:[%s530_s1 + $0x10] ss:$8 sps:$4 sm:$0xff]   ;;  %v22_v5 = vld [vmem:[%s529_s0] sm:$0xff]  ;;  %v23_v6 = vld [vmem:[%s529_s0 + $0x8] sm:$0xff] }
   0x3   :  { %66 = vmatpush1.bf16.msra.mxu0 %v359_v1  ;;  %v363_v7 = vld [vmem:[%s532_s3 + $0x40] sm:$0xff]   ;;  %v24_v9 = vpack.c.bf16 %v23_v6, %v22_v5  ;;  %v365_v10 = vld [vmem:[%s532_s3 + $0x48] sm:$0xff]   ;;  %v367_v12 = vld [vmem:[%s532_s3 + $0x50] sm:$0xff]  }
   0x4   :  { %67 = vmatprep.subr.bf16.mxu0 %v360_v3  ;;  %v364_v8 = vld [vmem:[%s532_s3] sm:$0xff]   ;;  %331 = vmatprep.subr.bf16.mxu1 %v363_v7  ;;  %v366_v11 = vld [vmem:[%s532_s3 + $0x8] sm:$0xff]   ;;  %v368_v13 = vld [vmem:[%s532_s3 + $0x10] sm:$0xff]  }
   0x5   :  { %332 = vmatpush3.bf16.msra.mxu1 %v364_v8 }
   0x6   :  { %333 = vmatprep.subr.bf16.mxu1 %v365_v10 }
   0x7   :  { %68 = vmatpush1.bf16.msra.mxu0 %v362_v4 }
   0x9   :  { %334 = vmatpush3.bf16.msra.mxu1 %v366_v11 }
   0xa   :  { %313 = vmatmul.mubr.msk.bf16.vlgmr.msra.gmra.mrb[0].mxu0 %vm61_vm0, %v24_v9  ;;  %335 = vmatprep.subr.bf16.mxu1 %v367_v12 }
   0xd   :  { %336 = vmatpush3.bf16.msra.mxu1 %v368_v13 }
   0xe   :  { %10 = vsyncpa [#allocation3], 0  ;;  %v369_v14 = vld [vmem:[%s532_s3 + $0x58] sm:$0xff]   ;;  %v371_v16 = vld [vmem:[%s532_s3 + $0x60] sm:$0xff]   ;;  %v31_v24 = vlaneseq  ;;  %s412_s0 = smov [#allocation2]   ;;  %vm290_vm1 = vcmask 785408  }
   0xf   :  { %v370_v15 = vld [vmem:[%s532_s3 + $0x18] sm:$0xff]   ;;  %337 = vmatprep.subr.bf16.mxu1 %v369_v14  ;;  %v372_v17 = vld [vmem:[%s532_s3 + $0x20] sm:$0xff]   ;;  %v373_v18 = vld [vmem:[%s532_s3 + $0x68] sm:$0xff]   ;;  %s298_s11 = sshll.u32 %s412_s0, 4  ;;  %s299_s11 = int_to_ptr.vmem [resolvable:$true] %s298_s11 }
  0x10   :  { %v374_v19 = vld [vmem:[%s532_s3 + $0x28] sm:$0xff]   ;;  %v375_v20 = vld [vmem:[%s532_s3 + $0x70] sm:$0xff]   ;;  %v377_v22 = vld [vmem:[%s532_s3 + $0x78] sm:$0xff]   ;;  %v32_v25 = vshrl.u32 %v31_v24, 7  ;;  %s387_s12 = scalar_lea.vmem %s299_s11, 256  ;;  %p392_p1 = scmp.lt.s32.totalorder %s299_s11, %s299_s11 }
  0x11   :  { %338 = vmatpush3.bf16.msra.mxu1 %v370_v15  ;;  %v376_v21 = vld [vmem:[%s532_s3 + $0x30] sm:$0xff]   ;;  %v378_v23 = vld [vmem:[%s532_s3 + $0x38] sm:$0xff]   ;;  %v29_v27 = vld [vmem:[%s531_s2] sm:$0x3]  ;;  %p388_p0 = scmp.ne.s32.totalorder %s299_s11, %s387_s12  ;;  %p393_p2 = scmp.lt.s32.totalorder %s387_s12, %s387_s12 }
  0x12   :  { %339 = vmatprep.subr.bf16.mxu1 %v371_v16  ;;  %v33_v26 = vsub.s32 0, %v32_v25  ;;  %v37_v28 = vsub.s32 1, %v32_v25  ;;  %v314_v46 = vld [vmem:[%s533_s4] ss:$0 sm:$0xff] }
  0x13   :  { %p394_p3 = por %p393_p2, %p392_p1 }
  0x14   :  { %v34_v29 = vrot.slane %v29_v27, %v33_v26  ;;  %v38_v30 = vrot.slane %v29_v27, %v37_v28 }
  0x15   :  { %340 = vmatpush3.bf16.msra.mxu1 %v372_v17  ;;  %p395_p4 = pnand %p394_p3, %p388_p0 }
  0x16   :  { %341 = vmatprep.subr.bf16.mxu1 %v373_v18 }
  0x19   :  { %342 = vmatpush3.bf16.msra.mxu1 %v374_v19 }
  0x1a   :  { %343 = vmatprep.subr.bf16.mxu1 %v375_v20 }
  0x1d   :  { %344 = vmatpush3.bf16.msra.mxu1 %v376_v21 }
  0x1e   :  { %345 = vmatprep.subr.bf16.mxu1 %v377_v22 }
  0x21   :  { %346 = vmatpush3.bf16.msra.mxu1 %v378_v23 }
  0xdd   :  { %v99_v31 = vpop.f32.mrb[0].mxu0 }
  0xde   :  { %v100_v32 = vadd.f32 %v99_v31, %v34_v29  ;;  %v101_v33 = vpop.f32.mrb[1].mxu0 }
  0xdf   :  { %v102_v34 = vadd.f32 %v101_v33, %v38_v30  ;;  %v103_v35 = vpop.f32.mrb[2].mxu0 }
  0xe0   :  { %379 = vtanh.f32 %v100_v32  ;;  %v104_v36 = vadd.f32 %v103_v35, %v34_v29  ;;  %v105_v37 = vpop.f32.mrb[3].mxu0 }
  0xe1   :  { %381 = vtanh.f32 %v102_v34  ;;  %v106_v38 = vadd.f32 %v105_v37, %v38_v30 }
  0xe2   :  { %383 = vtanh.f32 %v104_v36 }
  0xe3   :  { %385 = vtanh.f32 %v106_v38 }
  0xea   :  { %v380_v39 = vpop.eup %379 }
  0xeb   :  { %v382_v40 = vpop.eup %381 }
  0xec   :  { %v384_v41 = vpop.eup %383 }
  0xed   :  { %v386_v42 = vpop.eup %385  ;;  %v112_v43 = vpack.c.bf16 %v384_v41, %v380_v39 }
  0xee   :  { %v113_v44 = vpack.c.bf16 %v386_v42, %v382_v40 }
  0xf0   :  { %281 = vmatprep.mubr.bf16.mxu1 %v113_v44 }
  0xf1   :  { %282 = vmatmul.mubr.bf16.vlgmr.msra.gmra.mrb[0].mxu1 %v112_v43 }
 0x1c4   :  { %v347_v45 = vpop.f32.mrb[0].mxu1 }
 0x1c5   :  { %v348_v47 = vpop.f32.mrb[1].mxu1 }
 0x1c6   :  { %v349_v48 = vadd.f32 %v348_v47, %v347_v45  ;;  %v350_v49 = vpop.f32.mrb[2].mxu1 }
 0x1c7   :  { %v351_v50 = vpop.f32.mrb[3].mxu1 }
 0x1c8   :  { %v284_v51 = vadd.f32 %v349_v48, %v314_v46  ;;  %v352_v52 = vadd.f32 %v351_v50, %v350_v49 }
 0x1ca   :  { %291 = vst.msk [vmem:[#allocation2] sm:$0xff] %vm290_vm1, %v284_v51  ;;  %v287_v53 = vadd.f32 %v352_v52, %v314_v46 }
 0x1cc   :  { %292 = vst.msk [vmem:[#allocation2 + $0x8] sm:$0xff] %vm290_vm1, %v287_v53 }
 0x1cd   :  { %398 = shalt.err (!%p395_p4)
}
 0x1ce   :  { %s399_s14 = scalar_lea.hbm %s534_s5, 256 }
 0x1cf   :  { %p400_p5 = scmp.ne.s32.totalorder %s534_s5, %s399_s14  ;;  %p403_p6 = scmp.lt.u32.totalorder %s399_s14, %s534_s5 }
 0x1d1   :  { %p405_p7 = pnand %p403_p6, %p400_p5 }
 0x1d3   :  { %408 = shalt.err (!%p405_p7)
}
 0x1d4   :  { %s413_s19 = smov 128   ;;  %s414_s20 = smov 8  }
 0x1d5   :  { %304 = dma.vmem_to_hbm [thread:$0]  %s299_s11, 256, %s534_s5, [#allocation3], %s413_s19, %s413_s19, %s414_s20  }
 0x1d6   :  { %409 = dma.done.wait [#allocation3], 256  }
 0x1d7   :  { %410 = vsyncadd [#allocation3], 4294967040 }
 0x1d8   :  { %308 = vsyncpa [#allocation3], 1 }

</bundles_post_ra>
